<compile_context>
chip_gen: v7x
topology: tpu7x:2x2x1
jax: 0.10.0
libtpu: 0.0.40
codegen_flags: <defaults>
</compile_context>

<pallas_src>
import functools
import math

import jax
import jax.numpy as jnp
from jax.experimental import pallas as pl
from jax.experimental.pallas import tpu as pltpu


def _att_block_kernel(x_ref, w_ref, b_ref, *out_refs, c_out, c_pad,
                      compute_dtype, activation, return_maps):
    if return_maps:
        pooled_ref, natt_ref, cla_ref = out_refs
    else:
        (pooled_ref,) = out_refs

    batch_block = x_ref.shape[0]
    t = x_ref.shape[-1]

    w = w_ref[...]                                    # (2*C_pad, C_in), compute dtype
    b = b_ref[...]                                    # (2*C_pad, 1), f32

    # Cast x to the matmul dtype in VMEM (no wrapper-side HBM round trip) and
    # lane-concatenate the batch tile so ONE MXU pass covers every sample.
    slabs = [x_ref[i].astype(compute_dtype) for i in range(batch_block)]
    x2 = slabs[0] if batch_block == 1 else jnp.concatenate(slabs, axis=-1)   # (C_in, bb*T)

    # Fused projection for BOTH 1x1 convolutions, f32 accumulation, + bias
    # (bias broadcast happens once for the whole tile, outside the sample loop).
    proj = jnp.dot(w, x2, preferred_element_type=jnp.float32) + b            # (2*C_pad, bb*T)

    pooled_cols = []
    for bb in range(batch_block):                     # static unroll over the batch tile
        lo, hi = bb * t, (bb + 1) * t                 # aligned lane slices (T % 128 == 0 ideal)

        # --- attention branch: tanh bounds logits to [-1, 1] => no max pass needed.
        att = jnp.tanh(proj[:c_out, lo:hi])
        e = jnp.exp(att)
        denom = jnp.sum(e, axis=-1, keepdims=True)
        norm_att = e * pl.reciprocal(denom, approx=True)                     # (C_out, T)

        # --- classification branch (split at the sublane-aligned C_pad boundary).
        cla = proj[c_pad:c_pad + c_out, lo:hi]
        if activation == "sigmoid":
            cla = jax.nn.sigmoid(cla)

        if return_maps:
            natt_ref[bb] = norm_att.astype(natt_ref.dtype)
            cla_ref[bb] = cla.astype(cla_ref.dtype)

        # attention-weighted pooling over time -> (C_out, 1) column
        pooled_cols.append(jnp.sum(norm_att * cla, axis=-1, keepdims=True))

    pooled_cb = pooled_cols[0] if batch_block == 1 else jnp.concatenate(pooled_cols, axis=-1)
    # Lane-dense pooled store: (C_out, batch_block) -> (batch_block, C_out).
    pooled_ref[0] = jnp.transpose(pooled_cb).astype(pooled_ref.dtype)


def _round_up(v, m):
    return ((v + m - 1) // m) * m


def _vmem_capacity_bytes():
    try:
        return int(pltpu.get_tpu_info().vmem_capacity_bytes)
    except Exception:
        return 64 << 20          # conservative fallback (v7x per-core VMEM)


def _choose_batch_block(batch, est_vmem_bytes, step_io_bytes, budget):
    divisors = [d for d in range(1, batch + 1) if batch % d == 0]
    fits = [d for d in divisors if est_vmem_bytes(d) <= budget] or [1]
    cands = fits
    for min_steps in (4, 2):     # prefer >= 4 balanced grid steps (v7x: 2 TensorCores)
        c = [d for d in fits if batch // d >= min_steps]
        if c:
            cands = c
            break
    # Smallest block that still moves >= ~1 MiB per step (amortizes the ~0.35 us
    # per-step overhead); otherwise the largest candidate that fits.
    big = [d for d in cands if step_io_bytes(d) >= (1 << 20)]
    return min(big) if big else max(cands)


def att_block_v2(x, w_att, b_att, w_cla, b_cla, *, activation="sigmoid",
                 compute_dtype=jnp.bfloat16, maps_dtype=jnp.bfloat16,
                 pooled_dtype=None, batch_block=None, return_maps=True):
    """x: (B, C_in, T); w_*: (C_out, C_in); b_*: (C_out,)."""
    if activation not in ("sigmoid", "linear"):
        raise ValueError(f"unsupported activation: {activation}")
    B, C_in, T = x.shape
    C_out = w_att.shape[0]
    C_pad = _round_up(C_out, 8)          # sublane-aligned att/cla split boundary
    pooled_dtype = x.dtype if pooled_dtype is None else pooled_dtype

    # Stack (and row-pad) the two 1x1-conv weights into one (2*C_pad, C_in) matrix
    # so both convolutions are a single MXU pass.  Weights are tiny; these wrapper
    # ops are negligible next to the x read.
    def pad_rows(w):
        if C_pad == C_out:
            return w
        return jnp.concatenate([w, jnp.zeros((C_pad - C_out, C_in), w.dtype)], axis=0)

    def pad_vec(v):
        if C_pad == C_out:
            return v
        return jnp.concatenate([v, jnp.zeros((C_pad - C_out,), v.dtype)])

    w_stacked = jnp.concatenate([pad_rows(w_att), pad_rows(w_cla)], axis=0).astype(compute_dtype)
    b_stacked = (jnp.concatenate([pad_vec(b_att), pad_vec(b_cla)])
                 .reshape(2 * C_pad, 1).astype(jnp.float32))

    x_itm = jnp.dtype(x.dtype).itemsize
    cmp_itm = jnp.dtype(compute_dtype).itemsize
    map_itm = jnp.dtype(maps_dtype).itemsize if return_maps else 0

    def step_io_bytes(bb):
        # HBM <-> VMEM bytes per grid step (pipelined blocks only).
        return bb * (C_in * T * x_itm + 2 * C_out * T * map_itm + C_out * 4)

    def est_vmem_bytes(bb):
        io = 2 * step_io_bytes(bb)                          # double-buffered blocks
        weights = 2 * (2 * C_pad * C_in * cmp_itm + 2 * C_pad * 4)
        work = (bb * C_in * T * cmp_itm                     # casted / concatenated x2
                + 2 * C_pad * bb * T * 4                    # f32 projection
                + 4 * C_out * T * 4)                        # per-sample elementwise temps
        return io + weights + work + (1 << 20)              # + slack

    vmem_cap = _vmem_capacity_bytes()
    if batch_block is None:
        batch_block = _choose_batch_block(B, est_vmem_bytes, step_io_bytes,
                                          budget=int(0.75 * vmem_cap))
    if B % batch_block != 0:
        raise ValueError(f"batch_block={batch_block} must divide B={B}")
    num_blocks = B // batch_block

    # Always set the scoped-VMEM limit from the estimate (v5e's default is only
    # 16 MiB); never request more than ~90% of physical per-core VMEM (v7x: 64 MiB).
    est = est_vmem_bytes(batch_block)
    vmem_limit = int(min(max(int(1.5 * est), 32 << 20), int(0.9 * vmem_cap)))

    kernel = functools.partial(
        _att_block_kernel, c_out=C_out, c_pad=C_pad,
        compute_dtype=compute_dtype, activation=activation, return_maps=return_maps)

    out_shape = [jax.ShapeDtypeStruct((num_blocks, batch_block, C_out), pooled_dtype)]
    out_specs = [pl.BlockSpec((1, batch_block, C_out), lambda i: (i, 0, 0))]
    if return_maps:
        out_shape += [jax.ShapeDtypeStruct((B, C_out, T), maps_dtype),
                      jax.ShapeDtypeStruct((B, C_out, T), maps_dtype)]
        out_specs += [pl.BlockSpec((batch_block, C_out, T), lambda i: (i, 0, 0)),
                      pl.BlockSpec((batch_block, C_out, T), lambda i: (i, 0, 0))]

    grid_spec = pltpu.PrefetchScalarGridSpec(
        num_scalar_prefetch=0,
        grid=(num_blocks,),
        in_specs=[
            pl.BlockSpec((batch_block, C_in, T), lambda i: (i, 0, 0)),   # x, native dtype
            pl.BlockSpec((2 * C_pad, C_in), lambda i: (0, 0)),           # stacked weights
            pl.BlockSpec((2 * C_pad, 1), lambda i: (0, 0)),              # stacked bias
        ],
        out_specs=tuple(out_specs),
    )

    outs = pl.pallas_call(
        kernel,
        out_shape=tuple(out_shape),
        grid_spec=grid_spec,
        compiler_params=pltpu.CompilerParams(
            dimension_semantics=("parallel",),
            vmem_limit_bytes=vmem_limit),
    )(x, w_stacked, b_stacked)

    pooled = outs[0].reshape(B, C_out)     # free reshape (layout already row-major)
    if return_maps:
        return pooled, outs[1], outs[2]
    return pooled


def _xavier_uniform(key, shape):
    # Conv1d weight (out, in, 1): fan_in = in, fan_out = out (kernel_size=1).
    fan_out, fan_in = shape
    bound = math.sqrt(6.0 / (fan_in + fan_out))
    return jax.random.uniform(key, shape, dtype=jnp.float32,
                              minval=-bound, maxval=bound)


def _reference(x, w_att, b_att, w_cla, b_cla, activation="sigmoid"):
    att = jnp.einsum("oc,bct->bot", w_att, x) + b_att[None, :, None]
    norm_att = jax.nn.softmax(jnp.tanh(att), axis=-1)
    cla = jnp.einsum("oc,bct->bot", w_cla, x) + b_cla[None, :, None]
    if activation == "sigmoid":
        cla = jax.nn.sigmoid(cla)
    return jnp.sum(norm_att * cla, axis=2), norm_att, cla


if __name__ == "__main__":
    # T multiple of 128 -> lane-dense, unmasked map stores and free lane slices.
    B, C_in, C_out, T = 4, 64, 32, 128

    key = jax.random.PRNGKey(0)
    kx, ka, kc, kba, kbc = jax.random.split(key, 5)
    x = jax.random.normal(kx, (B, C_in, T), dtype=jnp.float32)
    w_att = _xavier_uniform(ka, (C_out, C_in))
    w_cla = _xavier_uniform(kc, (C_out, C_in))
    b_att = 0.1 * jax.random.normal(kba, (C_out,), dtype=jnp.float32)
    b_cla = 0.1 * jax.random.normal(kbc, (C_out,), dtype=jnp.float32)

    ref_pooled, ref_natt, ref_cla = _reference(x, w_att, b_att, w_cla, b_cla)

    # 1) Default path: bf16 matmul operands + bf16 maps, f32-accumulated pooled.
    pooled, natt, cla = att_block_v2(x, w_att, b_att, w_cla, b_cla)
    jax.block_until_ready((pooled, natt, cla))
    assert pooled.shape == (B, C_out)
    assert jnp.allclose(pooled, ref_pooled, atol=3e-2, rtol=3e-2), "pooled (bf16)"
    assert jnp.allclose(natt.astype(jnp.float32), ref_natt, atol=3e-2, rtol=3e-2), "norm_att (bf16)"
    assert jnp.allclose(cla.astype(jnp.float32), ref_cla, atol=3e-2, rtol=3e-2), "cla (bf16)"

    # 2) f32 compute + f32 maps (tighter check); batch_block=2 exercises the
    #    lane-concatenated multi-sample matmul path.
    pooled32, natt32, cla32 = att_block_v2(
        x, w_att, b_att, w_cla, b_cla, compute_dtype=jnp.float32,
        maps_dtype=jnp.float32, batch_block=2)
    jax.block_until_ready((pooled32, natt32, cla32))
    assert jnp.allclose(pooled32, ref_pooled, atol=5e-3, rtol=5e-3), "pooled (f32)"
    assert jnp.allclose(natt32, ref_natt, atol=5e-3, rtol=5e-3), "norm_att (f32)"
    assert jnp.allclose(cla32, ref_cla, atol=5e-3, rtol=5e-3), "cla (f32)"

    # 3) Pooled-only variant: skips both (B, C_out, T) HBM writebacks.
    pooled_only = att_block_v2(x, w_att, b_att, w_cla, b_cla, return_maps=False)
    jax.block_until_ready(pooled_only)
    assert jnp.allclose(pooled_only, ref_pooled, atol=3e-2, rtol=3e-2), "pooled_only"

    print("KERNEL_OK")
</pallas_src>

<mosaic_0001>
module attributes {stable_mosaic.version = 11 : i64} {
  func.func @_att_block_kernel(%arg0: i32, %arg1: memref<1x64x128xf32, #tpu.memory_space<vmem>>, %arg2: memref<64x64xbf16, #tpu.memory_space<vmem>>, %arg3: memref<64x1xf32, #tpu.memory_space<vmem>>, %arg4: memref<1x1x32xf32, #tpu.memory_space<vmem>>, %arg5: memref<1x32x128xbf16, #tpu.memory_space<vmem>>, %arg6: memref<1x32x128xbf16, #tpu.memory_space<vmem>>) attributes {dimension_semantics = [#tpu.dimension_semantics<parallel>], iteration_bounds = array<i64: 4>, scalar_prefetch = 0 : i64, scratch_operands = 0 : i64, tpu.core_type = #tpu.core_type<tc>, window_params = [{transform_indices = @transform_0, window_bounds = array<i64: 1, 64, 128>}, {pipeline_mode = #tpu.pipeline_mode<synchronous>, transform_indices = @transform_1, window_bounds = array<i64: 64, 64>}, {pipeline_mode = #tpu.pipeline_mode<synchronous>, transform_indices = @transform_2, window_bounds = array<i64: 64, 1>}, {transform_indices = @transform_3, window_bounds = array<i64: 1, 1, 32>}, {transform_indices = @transform_4, window_bounds = array<i64: 1, 32, 128>}, {transform_indices = @transform_5, window_bounds = array<i64: 1, 32, 128>}]} {
    %c0 = arith.constant 0 : index
    %c0_0 = arith.constant 0 : index
    %0 = vector.load %arg2[%c0, %c0_0] : memref<64x64xbf16, #tpu.memory_space<vmem>>, vector<64x64xbf16>
    %c0_1 = arith.constant 0 : index
    %c0_2 = arith.constant 0 : index
    %1 = vector.load %arg3[%c0_1, %c0_2] : memref<64x1xf32, #tpu.memory_space<vmem>>, vector<64x1xf32>
    %c0_3 = arith.constant 0 : index
    %c0_4 = arith.constant 0 : index
    %c0_5 = arith.constant 0 : index
    %2 = vector.load %arg1[%c0_3, %c0_4, %c0_5] : memref<1x64x128xf32, #tpu.memory_space<vmem>>, vector<1x64x128xf32>
    %3 = vector.shape_cast %2 : vector<1x64x128xf32> to vector<64x128xf32>
    %4 = arith.truncf %3 : vector<64x128xf32> to vector<64x128xbf16>
    %cst = arith.constant dense<0.000000e+00> : vector<64x128xf32>
    %5 = tpu.matmul %0, %4, %cst {dimension_numbers = #tpu.dot_dimension_numbers<[1], [0], [0], [1], [0, 0, 1, 1], [], []>} : vector<64x64xbf16>, vector<64x128xbf16>, vector<64x128xf32> -> vector<64x128xf32>
    %6 = vector.broadcast %1 : vector<64x1xf32> to vector<64x128xf32>
    %7 = arith.addf %5, %6 : vector<64x128xf32>
    %8 = vector.extract_strided_slice %7 {offsets = [0, 0], sizes = [32, 128], strides = [1, 1]} : vector<64x128xf32> to vector<32x128xf32>
    %9 = math.tanh %8 : vector<32x128xf32>
    %10 = math.exp %9 : vector<32x128xf32>
    %cst_6 = arith.constant dense<0.000000e+00> : vector<32xf32>
    %11 = vector.multi_reduction <add>, %10, %cst_6 [1] : vector<32x128xf32> to vector<32xf32>
    %12 = vector.shape_cast %11 : vector<32xf32> to vector<32x1xf32>
    %13 = tpu.reciprocal %12 {approx = true} : vector<32x1xf32> -> vector<32x1xf32>
    %14 = vector.broadcast %13 : vector<32x1xf32> to vector<32x128xf32>
    %15 = arith.mulf %10, %14 : vector<32x128xf32>
    %16 = vector.extract_strided_slice %7 {offsets = [32, 0], sizes = [32, 128], strides = [1, 1]} : vector<64x128xf32> to vector<32x128xf32>
    %17 = arith.negf %16 : vector<32x128xf32>
    %18 = math.exp %17 : vector<32x128xf32>
    %cst_7 = arith.constant 1.000000e+00 : f32
    %19 = vector.broadcast %cst_7 : f32 to vector<32x128xf32>
    %20 = arith.addf %19, %18 : vector<32x128xf32>
    %21 = arith.divf %19, %20 : vector<32x128xf32>
    %22 = arith.truncf %15 : vector<32x128xf32> to vector<32x128xbf16>
    %c0_8 = arith.constant 0 : index
    %c0_9 = arith.constant 0 : index
    %c0_10 = arith.constant 0 : index
    %23 = vector.load %arg5[%c0_8, %c0_9, %c0_10] : memref<1x32x128xbf16, #tpu.memory_space<vmem>>, vector<1x32x128xbf16>
    %24 = vector.shape_cast %23 : vector<1x32x128xbf16> to vector<32x128xbf16>
    %25 = vector.shape_cast %22 : vector<32x128xbf16> to vector<1x32x128xbf16>
    tpu.vector_store %arg5[%c0_8, %c0_9, %c0_10], %25 {strides = array<i32>} : memref<1x32x128xbf16, #tpu.memory_space<vmem>>, vector<1x32x128xbf16>,
    %26 = arith.truncf %21 : vector<32x128xf32> to vector<32x128xbf16>
    %c0_11 = arith.constant 0 : index
    %c0_12 = arith.constant 0 : index
    %c0_13 = arith.constant 0 : index
    %27 = vector.load %arg6[%c0_11, %c0_12, %c0_13] : memref<1x32x128xbf16, #tpu.memory_space<vmem>>, vector<1x32x128xbf16>
    %28 = vector.shape_cast %27 : vector<1x32x128xbf16> to vector<32x128xbf16>
    %29 = vector.shape_cast %26 : vector<32x128xbf16> to vector<1x32x128xbf16>
    tpu.vector_store %arg6[%c0_11, %c0_12, %c0_13], %29 {strides = array<i32>} : memref<1x32x128xbf16, #tpu.memory_space<vmem>>, vector<1x32x128xbf16>,
    %30 = arith.mulf %15, %21 : vector<32x128xf32>
    %cst_14 = arith.constant dense<0.000000e+00> : vector<32xf32>
    %31 = vector.multi_reduction <add>, %30, %cst_14 [1] : vector<32x128xf32> to vector<32xf32>
    %32 = vector.shape_cast %31 : vector<32xf32> to vector<32x1xf32>
    %33 = tpu.transpose %32, [1, 0] : vector<32x1xf32> -> vector<1x32xf32>
    %c0_15 = arith.constant 0 : index
    %c0_16 = arith.constant 0 : index
    %c0_17 = arith.constant 0 : index
    %34 = vector.load %arg4[%c0_15, %c0_16, %c0_17] : memref<1x1x32xf32, #tpu.memory_space<vmem>>, vector<1x1x32xf32>
    %35 = vector.shape_cast %34 : vector<1x1x32xf32> to vector<1x32xf32>
    %36 = vector.shape_cast %33 : vector<1x32xf32> to vector<1x1x32xf32>
    tpu.vector_store %arg4[%c0_15, %c0_16, %c0_17], %36 {strides = array<i32>} : memref<1x1x32xf32, #tpu.memory_space<vmem>>, vector<1x1x32xf32>,
    return
  }
  func.func @transform_0(%arg0: i32) -> (i32, i32, i32) {
    %c0_i32 = arith.constant 0 : i32
    %c0_i32_0 = arith.constant 0 : i32
    %c0_i32_1 = arith.constant 0 : i32
    return %arg0, %c0_i32, %c0_i32_0 : i32, i32, i32
  }
  func.func @transform_1(%arg0: i32) -> (i32, i32) {
    %c0_i32 = arith.constant 0 : i32
    %c0_i32_0 = arith.constant 0 : i32
    %c0_i32_1 = arith.constant 0 : i32
    return %c0_i32, %c0_i32_0 : i32, i32
  }
  func.func @transform_2(%arg0: i32) -> (i32, i32) {
    %c0_i32 = arith.constant 0 : i32
    %c0_i32_0 = arith.constant 0 : i32
    %c0_i32_1 = arith.constant 0 : i32
    return %c0_i32, %c0_i32_0 : i32, i32
  }
  func.func @transform_3(%arg0: i32) -> (i32, i32, i32) {
    %c0_i32 = arith.constant 0 : i32
    %c0_i32_0 = arith.constant 0 : i32
    %c0_i32_1 = arith.constant 0 : i32
    return %arg0, %c0_i32, %c0_i32_0 : i32, i32, i32
  }
  func.func @transform_4(%arg0: i32) -> (i32, i32, i32) {
    %c0_i32 = arith.constant 0 : i32
    %c0_i32_0 = arith.constant 0 : i32
    %c0_i32_1 = arith.constant 0 : i32
    return %arg0, %c0_i32, %c0_i32_0 : i32, i32, i32
  }
  func.func @transform_5(%arg0: i32) -> (i32, i32, i32) {
    %c0_i32 = arith.constant 0 : i32
    %c0_i32_0 = arith.constant 0 : i32
    %c0_i32_1 = arith.constant 0 : i32
    return %arg0, %c0_i32, %c0_i32_0 : i32, i32, i32
  }
}

</mosaic_0001>

<bundles_post_ra>
// kernel: tpu_custom_call.1
= control target key start
LH: loop header
LB: loop body
LE: loop exit
PB: predicated region body
PF: predicated region fallthrough
CT: control target
= control target key end

     0   :  { %11 = vsyncpa [#allocation3], 0  ;;  %s1443_s0 = inlined_call_operand.hbm [shape: f32[4,64,128], index: 0, kind: input, shape index: {}]   ;;  %s1444_s1 = inlined_call_operand.vmem [shape: bf16[64,64], index: 1, kind: input, shape index: {}]   ;;  %s1445_s2 = inlined_call_operand.vmem [shape: f32[64,1], index: 2, kind: input, shape index: {}]   ;;  %s1446_s3 = inlined_call_operand.hbm [shape: f32[4,1,32], index: 3, kind: output, shape index: {0}]   ;;  %s1447_s4 = inlined_call_operand.hbm [shape: bf16[4,32,128], index: 4, kind: output, shape index: {1}]   ;;  %s1448_s5 = inlined_call_operand.hbm [shape: bf16[4,32,128], index: 5, kind: output, shape index: {2}]  }
   0x1   :  { %13 = vsyncpa [#allocation3 + $0x1], 0 }
   0x2   :  { %14 = vsyncpa [#allocation4], 0 }
   0x3   :  { %16 = vsyncpa [#allocation4 + $0x1], 0 }
   0x4   :  { %17 = vsyncpa [#allocation7], 0 }
   0x5   :  { %19 = vsyncpa [#allocation7 + $0x1], 0  ;;  %s1156_s18 = smov 0   ;;  %s1158_s19 = smov 0  }
   0x6   :  { %s1160_s20 = smov 0   ;;  %s1162_s21 = smov 0  }
   0x7 LB: > { %s1177_s22 = sadd.s32 4294967295, %s1115_s21   ;;  %s747_s23 = sadd.s32 4294967294, %s1115_s21   ;;  %s1115_s21 = sphi %s1162_s21, %s1460_s21   ;;  %s1111_s20 = sphi %s1160_s20, %s1459_s20   ;;  %s1107_s19 = sphi %s1158_s19, %s1458_s19   ;;  %s1103_s18 = sphi %s1156_s18, %s1457_s18  }
   0x8   : > { %s1181_s24 = sadd.s32 1, %s1115_s21   ;;  %s32_s25 = sadd.s32 1, %s1111_s20 }
   0x9   : > { %s29_s26 = ssub.s32 %s1115_s21, %s1181_s24  ;;  %p39_p0 = scmp.ne.s32.totalorder %s1111_s20, %s1107_s19 }
   0xa   : > { %p30_p1 = scmp.eq.s32.totalorder %s29_s26, 0  ;;  %p40_p2 = scmp.eq.s32.totalorder %s1115_s21, 0 }
   0xb   : > { %p45_p3 = scmp.ne.s32.totalorder %s1107_s19, %s1103_s18  ;;  %p46_p4 = scmp.eq.s32.totalorder %s1177_s22, 0 }
   0xc   : > { %s1193_s27 = scalar_select %p30_p1, %s1111_s20, %s32_s25  }
   0xd   : > { %p1195_p5 = por %p40_p2, %p39_p0  ;;  %p1199_p6 = por %p46_p4, %p45_p3 }
   0xe   : > { %p111_p7 = scmp.eq.s32.totalorder %s1177_s22, 3  ;;  %p117_p8 = scmp.eq.s32.totalorder %s747_s23, 3 }
   0xf   : > { %p873_p9 = scmp.lt.s32.totalorder %s1115_s21, 4  ;;  %s195_s7 = sand.u32 1, %s1111_s20  }
  0x10   : > { %p1207_p10 = por %p111_p7, %p39_p0  ;;  %p1211_p11 = por %p117_p8, %p45_p3 }
  0x11   : > { %s786_s8 = sshll.u32 %s1115_s21, 10  ;;  %s750_s9 = sshll.u32 %s195_s7, 6 }
  0x12   : > { %s1452_s30 = scalar_select %p1207_p10, 1, 0 }
  0x13   : > { %s1453_s6 = scalar_select %p1211_p11, 1, 0 }
  0x14   : > { %s1220_s12 = scalar_lea.hbm %s1443_s0, %s786_s8  ;;  %s199_s13 = scalar_lea.vmem [#allocation2], %s750_s9 }
  0x15   : > { %s206_s14 = sshll.u32 %s199_s13, 4  ;;  %p1224_p12 = pnand %p873_p9, %p1195_p5  ;;  %s1228_s14 = int_to_ptr.vmem [resolvable:$true] %s206_s14 }
  0x16   : > { %s1230_s16 = scalar_lea.sflag [#allocation3], %s195_s7  ;;  %s959_s17 = scalar_lea.hbm %s1220_s12, 1024 }
  0x17   : > { %p960_p13 = scmp.ne.s32.totalorder %s1220_s12, %s959_s17  ;;  %p961_p0 = pneg %p1224_p12 }
  0x18   : > { %s964_s28 = scalar_lea.hbm %s1443_s0, 4096  ;;  %p965_p3 = scmp.lt.u32.totalorder %s1220_s12, %s1443_s0 }
  0x19   : > { %p962_p1 = pnand %p961_p0, %p960_p13  ;;  %p966_p4 = scmp.lt.u32.totalorder %s964_s28, %s959_s17 }
  0x1a   : > { %p968_p7 = scmp.lt.u32.totalorder %s959_s17, %s1220_s12 }
  0x1b   : > { %p963_p2 = pneg %p962_p1  ;;  %p967_p5 = por %p966_p4, %p965_p3 }
  0x1d   : > { %p969_p8 = por %p968_p7, %p967_p5 }
  0x1f   : > { %p970_p9 = pnand %p969_p8, %p963_p2 }
  0x21   : > { %973 = shalt.err (!%p970_p9)
}
  0x22   : > { %s974_s7 = scalar_lea.vmem %s1228_s14, 1024  ;;  %s1117_s10 = smov [#allocation2]  }
  0x23   : > { %p975_p13 = scmp.ne.s32.totalorder %s1228_s14, %s974_s7  ;;  %s979_s11 = sshll.u32 %s1117_s10, 4  ;;  %s980_s11 = int_to_ptr.vmem [resolvable:$false] %s979_s11 }
  0x24   : > { %s981_s13 = scalar_lea.vmem %s980_s11, 2048  ;;  %p982_p10 = scmp.lt.s32.totalorder %s1228_s14, %s980_s11 }
  0x25   : > { %p977_p1 = pnand %p975_p13, %p961_p0  ;;  %p983_p3 = scmp.lt.s32.totalorder %s981_s13, %s974_s7 }
  0x27   : > { %p978_p11 = pneg %p977_p1  ;;  %p984_p4 = por %p983_p3, %p982_p10 }
  0x29   : > { %p985_p5 = pnand %p984_p4, %p978_p11 }
  0x2b   : > { %988 = shalt.err (!%p985_p5)
}
  0x2c   : > { %s1118_s17 = smov 128   ;;  %s1119_s25 = smov 8  }
  0x2d   : > { %862 = dma.hbm_to_vmem [thread:$0]  (!%p1224_p12), %s1220_s12, 1024, %s1228_s14, %s1230_s16, %s1118_s17, %s1118_s17, %s1119_s25  }
  0x2e   : > { %p753_p0 = scmp.ge.s32.totalorder %s1115_s21, 1  ;;  %p214_p2 = scmp.lt.s32.totalorder %s1115_s21, 5 }
  0x30   : > { %p215_p7 = pnand %p753_p0, %p214_p2 }
  0x31   : > { %s1261_s26 = sand.u32 (!%p215_p7), 1, %s1107_s19  }
  0x32   : > { %218 = sbr.rel (%p215_p7) target bundleno = 789 (0x315), region = 32  ;;  %s754_s28 = sshll.u32 (!%p215_p7), %s1261_s26, 6 }
  0x33   : > { %s221_s8 = scalar_lea.sflag (!%p215_p7), [#allocation3], %s1261_s26  ;;  %s224_s9 = scalar_lea.vmem (!%p215_p7), [#allocation2], %s754_s28 }
  0x39   : > { %1090 = dma.done.wait (%p1199_p6), %s221_s8, 1024  }
  0x3a   : > { %1092 = vsyncadd (%p1199_p6), %s221_s8, 4294966272  ;;  %v1120_v0 = vmov 0   ;;  %v277_v1 = vld [vmem:[%s224_s9] sm:$0xff]  ;;  %v278_v2 = vld [vmem:[%s224_s9 + $0x8] sm:$0xff]  ;;  %vm349_vm0 = vcmask 523264   ;;  %s755_s25 = sshll.u32 %s1261_s26, 4 }
  0x3b   : > { %913 = vset.pattern.permute.xlu0 %v1120_v0  ;;  %914 = vset.pattern.permute.xlu1 %v1120_v0  ;;  %v279_v3 = vld [vmem:[%s224_s9 + $0x10] sm:$0xff]  ;;  %v285_v4 = vpack.c.bf16 %v278_v2, %v277_v1  ;;  %v280_v5 = vld [vmem:[%s224_s9 + $0x18] sm:$0xff]  ;;  %v281_v7 = vld [vmem:[%s224_s9 + $0x20] sm:$0xff]  ;;  %s1312_s28 = scalar_lea.vmem [#allocation8], %s755_s25  ;;  %s252_s8 = scalar_lea.vmem [#allocation6], %s755_s25 }
  0x3c   : > { %v286_v6 = vpack.c.bf16 %v280_v5, %v279_v3  ;;  %v282_v8 = vld [vmem:[%s224_s9 + $0x28] sm:$0xff]  ;;  %v915_v9 = vld [vmem:[%s1444_s1] sm:$0xff]   ;;  %v916_v10 = vld [vmem:[%s1444_s1 + $0x10] sm:$0xff]   ;;  %s617_s12 = sshll.u32 %s1312_s28, 4  ;;  %s569_s14 = sand.u32 1, %s1177_s22   ;;  %s1359_s12 = int_to_ptr.vmem [resolvable:$true] %s617_s12 }
  0x3d   : > { %827 = vmatprep.subr.bf16.mxu0 %v285_v4  ;;  %843 = vmatprep.subr.bf16.mxu1 %v285_v4  ;;  %v287_v11 = vpack.c.bf16 %v282_v8, %v281_v7  ;;  %v283_v12 = vld [vmem:[%s224_s9 + $0x30] sm:$0xff]  ;;  %v284_v13 = vld [vmem:[%s224_s9 + $0x38] sm:$0xff]  ;;  %v269_v14 = vld [vmem:[%s1445_s2] sm:$0xff]  ;;  %s601_s9 = sshll.u32 %s252_s8, 4  ;;  %s795_s29 = sshll.u32 %s1177_s22, 8  ;;  %s1318_s9 = int_to_ptr.vmem [resolvable:$true] %s601_s9 }
  0x3e   : > { %828 = vmatpush3.bf16.msra.mxu0 %v285_v4  ;;  %847 = vmatpush3.bf16.msra.mxu1 %v285_v4  ;;  %v271_v15 = vld [vmem:[%s1445_s2 + $0x10] sm:$0xff]  ;;  %v270_v16 = vld [vmem:[%s1445_s2 + $0x8] sm:$0xff]  ;;  %v288_v17 = vpack.c.bf16 %v284_v13, %v283_v12  ;;  %v272_v18 = vld [vmem:[%s1445_s2 + $0x18] sm:$0xff]  ;;  %s1328_s7 = scalar_lea.hbm %s1447_s4, %s795_s29  ;;  %s1330_s10 = scalar_lea.sflag [#allocation7], %s569_s14 }
  0x3f   : > { %829 = vmatprep.subr.bf16.mxu0 %v286_v6  ;;  %844 = vmatprep.subr.bf16.mxu1 %v286_v6  ;;  %v273_v19 = vld [vmem:[%s1445_s2 + $0x20] sm:$0xff]  ;;  %v917_v20 = vld [vmem:[%s1444_s1 + $0x8] sm:$0xff]   ;;  %v918_v21 = vld [vmem:[%s1444_s1 + $0x18] sm:$0xff]   ;;  %s989_s11 = scalar_lea.vmem %s1318_s9, 256  ;;  %p1455_p10 = scmp.ne.s32.totalorder %s1452_s30, 0 }
  0x40   : > { %835 = vmatprep.mubr.msk.bf16.mxu0 %vm349_vm0, %v915_v9  ;;  %839 = vmatprep.mubr.msk.bf16.mxu1 %vm349_vm0, %v916_v10  ;;  %v274_v22 = vld [vmem:[%s1445_s2 + $0x28] sm:$0xff]  ;;  %v275_v23 = vld [vmem:[%s1445_s2 + $0x30] sm:$0xff]  ;;  %v276_v24 = vld [vmem:[%s1445_s2 + $0x38] sm:$0xff]  ;;  %p990_p6 = scmp.ne.s32.totalorder %s1318_s9, %s989_s11  ;;  %s1121_s13 = smov [#allocation6]  }
  0x41   : > { %291 = vperm.xlu0 %913, %v269_v14   ;;  %301 = vperm.xlu1 %914, %v271_v15   ;;  %s993_s17 = sshll.u32 %s1121_s13, 4  ;;  %s994_s17 = int_to_ptr.vmem [resolvable:$false] %s993_s17 }
  0x42   : > { %830 = vmatpush3.bf16.msra.mxu0 %v286_v6  ;;  %848 = vmatpush3.bf16.msra.mxu1 %v286_v6  ;;  %p991_p11 = pnand %p990_p6, %p1455_p10  ;;  %s995_s25 = scalar_lea.vmem %s994_s17, 512 }
  0x43   : > { %831 = vmatprep.subr.bf16.mxu0 %v287_v11  ;;  %845 = vmatprep.subr.bf16.mxu1 %v287_v11  ;;  %p996_p8 = scmp.lt.s32.totalorder %s1318_s9, %s994_s17  ;;  %p997_p9 = scmp.lt.s32.totalorder %s995_s25, %s989_s11 }
  0x44   : > { %p992_p12 = pneg %p991_p11 }
  0x45   : > { %296 = vperm.xlu0 %913, %v270_v16   ;;  %306 = vperm.xlu1 %914, %v272_v18   ;;  %p998_p13 = por %p997_p9, %p996_p8 }
  0x46   : > { %832 = vmatpush3.bf16.msra.mxu0 %v287_v11  ;;  %849 = vmatpush3.bf16.msra.mxu1 %v287_v11 }
  0x47   : > { %833 = vmatprep.subr.bf16.mxu0 %v288_v17  ;;  %846 = vmatprep.subr.bf16.mxu1 %v288_v17  ;;  %p999_p1 = pnand %p998_p13, %p992_p12 }
  0x49   : > { %311 = vperm.xlu0 %913, %v273_v19   ;;  %316 = vperm.xlu1 %914, %v274_v22  }
  0x4a   : > { %834 = vmatpush3.bf16.msra.mxu0 %v288_v17  ;;  %850 = vmatpush3.bf16.msra.mxu1 %v288_v17 }
  0x4d   : > { %836 = vmatmul.mubr.msk.bf16.vlgmr.msra.gmra.mrb[0].mxu0 %vm349_vm0, %v917_v20  ;;  %840 = vmatmul.mubr.msk.bf16.vlgmr.msra.gmra.mrb[0].mxu1 %vm349_vm0, %v918_v21 }
  0x4e   : > { %321 = vperm.xlu0 %913, %v275_v23   ;;  %326 = vperm.xlu1 %914, %v276_v24  }
  0xc0   : > { %v292_v25 = vpop.permute.xlu0 %291  ;;  %v302_v26 = vpop.permute.xlu1 %301 }
  0xc4   : > { %v297_v27 = vpop.permute.xlu0 %296  ;;  %v307_v28 = vpop.permute.xlu1 %306 }
  0xc8   : > { %v312_v29 = vpop.permute.xlu0 %311  ;;  %v317_v30 = vpop.permute.xlu1 %316 }
  0xcd   : > { %v322_v31 = vpop.permute.xlu0 %321  ;;  %v327_v32 = vpop.permute.xlu1 %326 }
 0x120   : > { %v837_v33 = vpop.f32.mrb[0].mxu0  ;;  %v841_v34 = vpop.f32.mrb[0].mxu1 }
 0x121   : > { %v405_v35 = vadd.f32 %v837_v33, %v302_v26  ;;  %v421_v36 = vadd.f32 %v841_v34, %v322_v31  ;;  %v396_v37 = vpop.f32.mrb[1].mxu0  ;;  %v412_v38 = vpop.f32.mrb[1].mxu1 }
 0x122   : > { %v397_v39 = vadd.f32 %v396_v37, %v292_v25  ;;  %v413_v40 = vadd.f32 %v412_v38, %v312_v29  ;;  %v838_v41 = vpop.f32.mrb[2].mxu0  ;;  %v842_v42 = vpop.f32.mrb[2].mxu1 }
 0x123   : > { %919 = vtanh.f32 %v405_v35  ;;  %v767_v43 = vmul.f32 -1.442695, %v421_v36  ;;  %v408_v44 = vadd.f32 %v838_v41, %v307_v28  ;;  %v424_v45 = vadd.f32 %v842_v42, %v327_v32  ;;  %v399_v46 = vpop.f32.mrb[3].mxu0  ;;  %v415_v47 = vpop.f32.mrb[3].mxu1 }
 0x124   : > { %921 = vtanh.f32 %v397_v39  ;;  %v765_v48 = vmul.f32 -1.442695, %v413_v40  ;;  %v416_v49 = vadd.f32 %v415_v47, %v317_v30  ;;  %v400_v51 = vadd.f32 %v399_v46, %v297_v27 }
 0x125   : > { %923 = vpow2.f32 %v767_v43  ;;  %v768_v50 = vmul.f32 -1.442695, %v424_v45 }
 0x126   : > { %925 = vpow2.f32 %v765_v48  ;;  %v766_v52 = vmul.f32 -1.442695, %v416_v49 }
 0x127   : > { %927 = vtanh.f32 %v408_v44 }
 0x128   : > { %929 = vpow2.f32 %v768_v50 }
 0x129   : > { %931 = vtanh.f32 %v400_v51 }
 0x12a   : > { %933 = vpow2.f32 %v766_v52 }
 0x12d   : > { %v920_v53 = vpop.eup %919 }
 0x12e   : > { %v922_v54 = vpop.eup %921  ;;  %v435_v55 = vmul.f32 1.442695, %v920_v53 }
 0x12f   : > { %v924_v56 = vpop.eup %923  ;;  %v431_v57 = vmul.f32 1.442695, %v922_v54 }
 0x130   : > { %v926_v58 = vpop.eup %925  ;;  %v469_v59 = vadd.f32 1.0, %v924_v56 }
 0x131   : > { %v928_v60 = vpop.eup %927  ;;  %935 = vpow2.f32 %v431_v57  ;;  %v467_v61 = vadd.f32 1.0, %v926_v58 }
 0x132   : > { %v930_v62 = vpop.eup %929  ;;  %937 = vpow2.f32 %v435_v55  ;;  %v437_v3 = vmul.f32 1.442695, %v928_v60 }
 0x133   : > { %v932_v63 = vpop.eup %931  ;;  %939 = vrcp.f32 %v469_v59  ;;  %v470_v0 = vadd.f32 1.0, %v930_v62 }
 0x134   : > { %v934_v1 = vpop.eup %933  ;;  %941 = vrcp.f32 %v467_v61  ;;  %v433_v2 = vmul.f32 1.442695, %v932_v63 }
 0x135   : > { %943 = vrcp.f32 %v470_v0  ;;  %v468_v4 = vadd.f32 1.0, %v934_v1 }
 0x136   : > { %945 = vpow2.f32 %v433_v2 }
 0x137   : > { %947 = vrcp.f32 %v468_v4 }
 0x138   : > { %949 = vpow2.f32 %v437_v3 }
 0x13b   : > { %v936_v5 = vpop.eup %935 }
 0x13c   : > { %v938_v6 = vpop.eup %937  ;;  %439 = vadd.xlane.f32.xlu0 %v936_v5 }
 0x13d   : > { %v940_v7 = vpop.eup %939 }
 0x13e   : > { %v942_v8 = vpop.eup %941 }
 0x13f   : > { %v944_v9 = vpop.eup %943 }
 0x140   : > { %v946_v10 = vpop.eup %945  ;;  %v815_v11 = vpack.c.bf16 %v944_v9, %v940_v7  ;;  %443 = vadd.xlane.f32.xlu0 %v938_v6 }
 0x141   : > { %v948_v12 = vpop.eup %947  ;;  %441 = vadd.xlane.f32.xlu1 %v946_v10 }
 0x142   : > { %v810_v13 = vpack.c.bf16 %v948_v12, %v942_v8  ;;  %818 = vst [vmem:[%s1312_s28 + $0x8] sm:$0xff] %v815_v11   ;;  %v950_v14 = vpop.eup %949 }
 0x144   : > { %445 = vadd.xlane.f32.xlu0 %v950_v14  ;;  %811 = vst [vmem:[%s1312_s28] sm:$0xff] %v810_v13  }
 0x1c9   : > { %v440_v15 = vpop.xlane.xlu0 %439 }
 0x1ca   : > { %951 = vrcp.f32 %v440_v15 }
 0x1cd   : > { %v444_v16 = vpop.xlane.xlu0 %443 }
 0x1ce   : > { %v442_v17 = vpop.xlane.xlu1 %441  ;;  %953 = vrcp.f32 %v444_v16 }
 0x1cf   : > { %955 = vrcp.f32 %v442_v17 }
 0x1d1   : > { %v446_v18 = vpop.xlane.xlu0 %445 }
 0x1d2   : > { %957 = vrcp.f32 %v446_v18 }
 0x1d4   : > { %v952_v19 = vpop.eup %951 }
 0x1d5   : > { %v451_v20 = vmul.f32 %v952_v19, %v936_v5 }
 0x1d7   : > { %v519_v21 = vmul.f32 %v942_v8, %v451_v20 }
 0x1d8   : > { %v954_v22 = vpop.eup %953 }
 0x1d9   : > { %v956_v23 = vpop.eup %955  ;;  %523 = vadd.xlane.f32.xlu1 %v519_v21  ;;  %v453_v24 = vmul.f32 %v954_v22, %v938_v6 }
 0x1da   : > { %v452_v25 = vmul.f32 %v956_v23, %v946_v10 }
 0x1db   : > { %v521_v26 = vmul.f32 %v940_v7, %v453_v24 }
 0x1dc   : > { %v958_v27 = vpop.eup %957  ;;  %v520_v28 = vmul.f32 %v948_v12, %v452_v25  ;;  %v800_v29 = vpack.c.bf16 %v452_v25, %v451_v20 }
 0x1dd   : > { %527 = vadd.xlane.f32.xlu1 %v521_v26  ;;  %v454_v30 = vmul.f32 %v958_v27, %v950_v14 }
 0x1de   : > { %525 = vadd.xlane.f32.xlu0 %v520_v28  ;;  %801 = vst [vmem:[%s252_s8] sm:$0xff] %v800_v29  }
 0x1df   : > { %v522_v31 = vmul.f32 %v944_v9, %v454_v30  ;;  %v805_v32 = vpack.c.bf16 %v454_v30, %v453_v24 }
 0x1e1   : > { %817 = vst [vmem:[%s252_s8 + $0x8] sm:$0xff] %v805_v32  }
 0x1e2   : > { %529 = vadd.xlane.f32.xlu0 %v522_v31 }
 0x266   : > { %v524_v33 = vpop.xlane.xlu1 %523 }
 0x267   : > { %531 = vxpose.xlu1.b32.start [1/4] (short) (narrow) %v524_v33, 8 }
 0x26b   : > { %v526_v34 = vpop.xlane.xlu0 %525 }
 0x26c   : > { %532 = vxpose.xlu1.b32.cont [2/4] (short) (narrow) %v526_v34, 8 }
 0x26d   : > { %1002 = shalt.err (!%p999_p1)
}
 0x26e   : > { %s1003_s8 = scalar_lea.hbm %s1328_s7, 256  ;;  %s1007_s16 = scalar_lea.hbm %s1447_s4, 1024 }
 0x26f   : > { %p1004_p3 = scmp.ne.s32.totalorder %s1328_s7, %s1003_s8  ;;  %p1008_p0 = scmp.lt.u32.totalorder %s1328_s7, %s1447_s4 }
 0x270   : > { %p1009_p2 = scmp.lt.u32.totalorder %s1007_s16, %s1003_s8  ;;  %p1011_p6 = scmp.lt.u32.totalorder %s1003_s8, %s1328_s7 }
 0x271   : > { %p1005_p4 = pnand %p1004_p3, %p1455_p10 }
 0x272   : > { %p1010_p7 = por %p1009_p2, %p1008_p0 }
 0x273   : > { %p1006_p5 = pneg %p1005_p4 }
 0x274   : > { %p1012_p11 = por %p1011_p6, %p1010_p7 }
 0x276   : > { %p1013_p12 = pnand %p1012_p11, %p1006_p5 }
 0x278   : > { %1016 = shalt.err (!%p1013_p12)
}
 0x279   : > { %s1122_s11 = smov 64   ;;  %s1123_s25 = smov 4   ;;  %v528_v35 = vpop.xlane.xlu1 %527 }
 0x27a   : > { %854 = dma.vmem_to_hbm [thread:$0]  (%p1455_p10), %s1318_s9, 256, %s1328_s7, %s1330_s10, %s1122_s11, %s1122_s11, %s1123_s25   ;;  %533 = vxpose.xlu1.b32.cont [3/4] (short) (narrow) %v528_v35, 8 }
 0x27b   : > { %s1366_s15 = scalar_lea.hbm %s1448_s5, %s795_s29  ;;  %s1017_s16 = scalar_lea.vmem %s1359_s12, 256 }
 0x27c   : > { %p1018_p8 = scmp.ne.s32.totalorder %s1359_s12, %s1017_s16  ;;  %s1124_s9 = smov [#allocation8]  }
 0x27d   : > { %s1021_s28 = sshll.u32 %s1124_s9, 4  ;;  %s1022_s28 = int_to_ptr.vmem [resolvable:$false] %s1021_s28 }
 0x27e   : > { %p1019_p9 = pnand %p1018_p8, %p1455_p10  ;;  %s1023_s7 = scalar_lea.vmem %s1022_s28, 512 }
 0x27f   : > { %p1024_p1 = scmp.lt.s32.totalorder %s1359_s12, %s1022_s28  ;;  %p1025_p3 = scmp.lt.s32.totalorder %s1023_s7, %s1017_s16 }
 0x280   : > { %p1020_p13 = pneg %p1019_p9 }
 0x281   : > { %p1026_p4 = por %p1025_p3, %p1024_p1 }
 0x283   : > { %p1027_p5 = pnand %p1026_p4, %p1020_p13 }
 0x285   : > { %1030 = shalt.err (!%p1027_p5)
}
 0x286   : > { %s1031_s29 = scalar_lea.hbm %s1366_s15, 256  ;;  %s1035_s8 = scalar_lea.hbm %s1448_s5, 1024 }
 0x287   : > { %p1032_p0 = scmp.ne.s32.totalorder %s1366_s15, %s1031_s29  ;;  %p1036_p6 = scmp.lt.u32.totalorder %s1366_s15, %s1448_s5 }
 0x288   : > { %p1037_p11 = scmp.lt.u32.totalorder %s1035_s8, %s1031_s29  ;;  %p1039_p8 = scmp.lt.u32.totalorder %s1031_s29, %s1366_s15 }
 0x289   : > { %p1033_p2 = pnand %p1032_p0, %p1455_p10 }
 0x28a   : > { %p1038_p12 = por %p1037_p11, %p1036_p6 }
 0x28b   : > { %p1034_p7 = pneg %p1033_p2 }
 0x28c   : > { %p1040_p9 = por %p1039_p8, %p1038_p12 }
 0x28e   : > { %p1041_p13 = pnand %p1040_p9, %p1034_p7 }
 0x290   : > { %1044 = shalt.err (!%p1041_p13)
}
 0x291   : > { %855 = dma.vmem_to_hbm [thread:$0]  (%p1455_p10), %s1359_s12, 256, %s1366_s15, %s1330_s10, %s1122_s11, %s1122_s11, %s1123_s25   ;;  %v530_v36 = vpop.xlane.xlu0 %529  ;;  %vm563_vm1 = vcmask 253952  }
 0x292   : > { %534 = vxpose.xlu1.b32.end [4/4] (short) (narrow) %v530_v36, 8  ;;  %s779_s16 = sshll.u32 %s1177_s22, 4  ;;  %s245_s28 = scalar_lea.vmem [#allocation5], %s1261_s26 }
 0x293   : > { %s588_s7 = sshll.u32 %s245_s28, 4  ;;  %s1398_s17 = scalar_lea.hbm %s1446_s3, %s779_s16  ;;  %s1400_s7 = int_to_ptr.vmem [resolvable:$true] %s588_s7 }
 0x294   : > { %s566_s8 = scalar_lea.sflag [#allocation4], %s1261_s26  ;;  %s1045_s12 = scalar_lea.vmem %s1400_s7, 16 }
 0x295   : > { %p1046_p1 = scmp.ne.s32.totalorder %s1400_s7, %s1045_s12  ;;  %s1125_s22 = smov [#allocation5]  }
 0x296   : > { %s1049_s10 = sshll.u32 %s1125_s22, 4  ;;  %s1050_s10 = int_to_ptr.vmem [resolvable:$false] %s1049_s10 }
 0x297   : > { %p1047_p3 = pnand %p1046_p1, %p1455_p10  ;;  %s1051_s11 = scalar_lea.vmem %s1050_s10, 32 }
 0x298   : > { %p1052_p5 = scmp.lt.s32.totalorder %s1400_s7, %s1050_s10  ;;  %p1053_p0 = scmp.lt.s32.totalorder %s1051_s11, %s1045_s12 }
 0x299   : > { %p1048_p4 = pneg %p1047_p3 }
 0x29a   : > { %p1054_p2 = por %p1053_p0, %p1052_p5 }
 0x29c   : > { %p1055_p7 = pnand %p1054_p2, %p1048_p4 }
 0x306   : > { %v547_v37 = vpop.trf.xlu1 }
 0x307   : > { %564 = vst.msk [vmem:[%s245_s28] sm:$0x1] %vm563_vm1, %v547_v37 }
 0x308   : > { %1058 = shalt.err (!%p1055_p7)
}
 0x309   : > { %s1059_s26 = scalar_lea.hbm %s1398_s17, 16  ;;  %s1063_s14 = scalar_lea.hbm %s1446_s3, 64 }
 0x30a   : > { %p1060_p6 = scmp.ne.s32.totalorder %s1398_s17, %s1059_s26  ;;  %p1064_p8 = scmp.lt.u32.totalorder %s1398_s17, %s1446_s3 }
 0x30b   : > { %p1065_p9 = scmp.lt.u32.totalorder %s1063_s14, %s1059_s26  ;;  %p1067_p1 = scmp.lt.u32.totalorder %s1059_s26, %s1398_s17 }
 0x30c   : > { %p1061_p11 = pnand %p1060_p6, %p1455_p10 }
 0x30d   : > { %p1066_p13 = por %p1065_p9, %p1064_p8 }
 0x30e   : > { %p1062_p12 = pneg %p1061_p11 }
 0x30f   : > { %p1068_p3 = por %p1067_p1, %p1066_p13 }
 0x311   : > { %p1069_p4 = pnand %p1068_p3, %p1062_p12 }
 0x313   : > { %1072 = shalt.err (!%p1069_p4)
}
 0x314   : > { %853 = dma.vmem_to_hbm [thread:$0]  (%p1455_p10), %s1400_s7, 16, %s1398_s17, %s566_s8  }
 0x315 PF: > { %p874_p5 = scmp.ge.s32.totalorder %s1115_s21, 2  ;;  %s632_s28 = sand.u32 1, %s1103_s18  }
 0x316   : > { %p1456_p0 = scmp.ne.s32.totalorder %s1453_s6, 0  ;;  %s633_s29 = scalar_lea.sflag [#allocation4], %s632_s28 }
 0x318   : > { %p864_p2 = pnand %p874_p5, %p1456_p0 }
 0x31a   : > { %1094 = dma.done.wait (!%p864_p2), %s633_s29, 16  }
 0x31b   : > { %1096 = vsyncadd (!%p864_p2), %s633_s29, 4294967280  ;;  %s640_s13 = sand.u32 1, %s747_s23  }
 0x31c   : > { %s641_s12 = scalar_lea.sflag [#allocation7], %s640_s13 }
 0x31d   : > { %1098 = dma.done.wait (!%p864_p2), %s641_s12, 512  }
 0x31e   : > { %1100 = vsyncadd (!%p864_p2), %s641_s12, 4294966784  ;;  %p22_p10 = scmp.ge.s32.totalorder %s1181_s24, 6   ;;  %s1457_s18 = smov %s1107_s19 }
 0x31f   : > { %s1458_s19 = smov %s1111_s20  ;;  %s1459_s20 = smov %s1193_s27 }
 0x320   : > { %s1460_s21 = smov %s1181_s24  ;;  %24 = sbr.rel (!%p22_p10) target bundleno = 7 (0x7), region = 109 }
 0x327   :  { %655 = vsyncpa [#allocation3], 1 }
 0x328   :  { %657 = vsyncpa [#allocation3 + $0x1], 1 }
 0x329   :  { %658 = vsyncpa [#allocation4], 1 }
 0x32a   :  { %660 = vsyncpa [#allocation4 + $0x1], 1 }
 0x32b   :  { %661 = vsyncpa [#allocation7], 1 }
 0x32c   :  { %663 = vsyncpa [#allocation7 + $0x1], 1 }

</bundles_post_ra>
